<compile_context>
chip_gen: v7x
topology: tpu7x:2x2x1
jax: 0.10.0
libtpu: 0.0.40
codegen_flags: <defaults>
</compile_context>

<pallas_src>
import jax
import jax.numpy as jnp
from jax.experimental import pallas as pl
from jax.experimental.pallas import tpu as pltpu


def _round_up(x, m):
    return ((x + m - 1) // m) * m


def _focal_tile_kernel(logits_ref, targets_ref, out_ref, *, gamma, n_rows,
                       tile_n, alpha_ref=None):
    """One row tile: writes the tile's partial focal-loss sum as a (1, 1) block."""
    i = pl.program_id(0)

    x = logits_ref[...].astype(jnp.float32)                 # (TILE_N, C)
    t = targets_ref[...]                                    # (TILE_N, 1) int32
    tn, c = x.shape

    col = jax.lax.broadcasted_iota(jnp.int32, (tn, c), 1)   # class idx (lanes)
    row = jax.lax.broadcasted_iota(jnp.int32, (tn, 1), 0)   # row idx (sublanes)
    valid = (i * tile_n + row) < n_rows                     # mask padded edge rows

    is_t = col == t                                         # (TILE_N, C) bool

    # numerically-stable log-softmax -> per-row cross entropy (no one-hot temp)
    m = jnp.max(x, axis=-1, keepdims=True)
    lse = jnp.log(jnp.sum(jnp.exp(x - m), axis=-1, keepdims=True)) + m
    tgt_logit = jnp.sum(jnp.where(is_t, x, 0.0), axis=-1, keepdims=True)
    ce = jnp.maximum(lse - tgt_logit, 0.0)                  # (TILE_N, 1), >= 0

    pt = jnp.exp(-ce)
    u = 1.0 - pt
    if gamma == 2.0:            # module default: one VPU multiply, no pow
        w = u * u
    elif gamma == 1.0:
        w = u
    elif gamma == 0.0:
        w = jnp.ones_like(u)
    else:                       # general gamma; base clamped >= 0
        w = jnp.maximum(u, 0.0) ** gamma
    focal = w * ce                                          # (TILE_N, 1)

    if alpha_ref is not None:
        a = alpha_ref[...].astype(jnp.float32)              # (1, C)
        alpha_t = jnp.sum(jnp.where(is_t, a, 0.0), axis=-1, keepdims=True)
        focal = focal * alpha_t

    focal = jnp.where(valid, focal, 0.0)
    out_ref[...] = jnp.sum(focal, axis=0, keepdims=True)    # (1, 1) partial sum


def focal_loss(logits, targets, *, gamma=2.0, alpha=None, tile_n=None):
    """Pallas TPU focal loss.

    logits: (N, C) float (f32 or bf16), targets: (N,) int. Returns a scalar
    float32 mean focal loss, matching the PyTorch module's forward.
    """
    N, C = logits.shape
    targets2d = targets.reshape(N, 1).astype(jnp.int32)
    gamma = float(gamma)

    if tile_n is None:
        # Keep the double-buffered logits tile comfortably under the smallest
        # scoped-VMEM default across generations (v5e 16 MiB), leaving room for
        # the in-kernel f32 upcast: 2 * tile_n * C * itemsize <= ~8 MiB.
        itemsize = jnp.dtype(logits.dtype).itemsize
        budget = 8 * 1024 * 1024
        tile_n = budget // max(1, 2 * C * itemsize)
        tile_n = max(8, min(1024, (tile_n // 8) * 8))
    tile_n = int(min(tile_n, _round_up(N, 8)))
    num_tiles = (N + tile_n - 1) // tile_n

    use_alpha = alpha is not None
    if use_alpha:
        alpha2d = jnp.asarray(alpha, dtype=jnp.float32).reshape(1, C)

        def kernel(logits_ref, targets_ref, alpha_ref, out_ref):
            _focal_tile_kernel(logits_ref, targets_ref, out_ref,
                               gamma=gamma, n_rows=N, tile_n=tile_n,
                               alpha_ref=alpha_ref)

        in_specs = [
            pl.BlockSpec((tile_n, C), lambda i: (i, 0)),
            pl.BlockSpec((tile_n, 1), lambda i: (i, 0)),
            pl.BlockSpec((1, C), lambda i: (0, 0)),
        ]
        args = (logits, targets2d, alpha2d)
    else:
        def kernel(logits_ref, targets_ref, out_ref):
            _focal_tile_kernel(logits_ref, targets_ref, out_ref,
                               gamma=gamma, n_rows=N, tile_n=tile_n)

        in_specs = [
            pl.BlockSpec((tile_n, C), lambda i: (i, 0)),
            pl.BlockSpec((tile_n, 1), lambda i: (i, 0)),
        ]
        args = (logits, targets2d)

    partials = pl.pallas_call(
        kernel,
        out_shape=jax.ShapeDtypeStruct((num_tiles, 1), jnp.float32),
        grid=(num_tiles,),
        in_specs=in_specs,
        out_specs=pl.BlockSpec((1, 1), lambda i: (i, 0)),
        compiler_params=pltpu.CompilerParams(
            dimension_semantics=("parallel",)),
    )(*args)

    # Final reduction over the tiny (num_tiles, 1) partial-sum vector in JAX;
    # divide by the true (unpadded) row count.
    return jnp.sum(partials) / N


def focal_loss_ref(logits, targets, *, gamma=2.0, alpha=None):
    """Pure-JAX reference (mirrors the PyTorch module)."""
    logz = jax.nn.log_softmax(logits.astype(jnp.float32), axis=-1)
    ce = -jnp.take_along_axis(logz, targets[:, None].astype(jnp.int32),
                              axis=-1)[:, 0]
    pt = jnp.exp(-ce)
    focal = (1.0 - pt) ** gamma * ce
    if alpha is not None:
        focal = focal * jnp.asarray(alpha, jnp.float32)[targets]
    return jnp.mean(focal)


if __name__ == "__main__":
    key = jax.random.PRNGKey(0)
    k1, k2, k3, k4 = jax.random.split(key, 4)

    # Small classification batch consistent with the module: batch=8, classes=4
    N, C = 8, 4
    logits = jax.random.normal(k1, (N, C), dtype=jnp.float32)
    targets = jax.random.randint(k2, (N,), 0, C, dtype=jnp.int32)

    out = jax.block_until_ready(focal_loss(logits, targets, gamma=2.0))
    ref = focal_loss_ref(logits, targets, gamma=2.0)
    assert jnp.allclose(out, ref, atol=1e-5, rtol=1e-5), (out, ref)

    # alpha path (per-class weights)
    alpha = jnp.array([0.25, 0.5, 0.75, 1.0], dtype=jnp.float32)
    out_a = jax.block_until_ready(
        focal_loss(logits, targets, gamma=2.0, alpha=alpha))
    ref_a = focal_loss_ref(logits, targets, gamma=2.0, alpha=alpha)
    assert jnp.allclose(out_a, ref_a, atol=1e-5, rtol=1e-5), (out_a, ref_a)

    # Multi-tile + ragged edge (exercises the in-kernel row mask) with bf16
    # logits DMA'd as bf16: N=37 rows, tile_n=16 -> 3 tiles, last one partial.
    N2, C2 = 37, 16
    logits2 = jax.random.normal(k3, (N2, C2)).astype(jnp.bfloat16)
    targets2 = jax.random.randint(k4, (N2,), 0, C2, dtype=jnp.int32)
    out2 = jax.block_until_ready(
        focal_loss(logits2, targets2, gamma=2.0, tile_n=16))
    ref2 = focal_loss_ref(logits2.astype(jnp.float32), targets2, gamma=2.0)
    assert jnp.allclose(out2, ref2, atol=2e-3, rtol=2e-3), (out2, ref2)

    print("KERNEL_OK")
</pallas_src>

<mosaic_0001>
module attributes {stable_mosaic.version = 11 : i64} {
  func.func @kernel(%arg0: i32, %arg1: memref<8x4xf32, #tpu.memory_space<vmem>>, %arg2: memref<8x1xi32, #tpu.memory_space<vmem>>, %arg3: memref<1x1xf32, #tpu.memory_space<vmem>>) attributes {dimension_semantics = [#tpu.dimension_semantics<parallel>], iteration_bounds = array<i64: 1>, scalar_prefetch = 0 : i64, scratch_operands = 0 : i64, tpu.core_type = #tpu.core_type<tc>, window_params = [{transform_indices = @transform_0, window_bounds = array<i64: 8, 4>}, {transform_indices = @transform_1, window_bounds = array<i64: 8, 1>}, {transform_indices = @transform_2, window_bounds = array<i64: 1, 1>}]} {
    %c0 = arith.constant 0 : index
    %c0_0 = arith.constant 0 : index
    %0 = vector.load %arg1[%c0, %c0_0] : memref<8x4xf32, #tpu.memory_space<vmem>>, vector<8x4xf32>
    %c0_1 = arith.constant 0 : index
    %c0_2 = arith.constant 0 : index
    %1 = vector.load %arg2[%c0_1, %c0_2] : memref<8x1xi32, #tpu.memory_space<vmem>>, vector<8x1xi32>
    %2 = tpu.iota {dimensions = array<i32: 1>} : vector<8x4xi32>
    %3 = tpu.iota {dimensions = array<i32: 0>} : vector<8x1xi32>
    %c8_i32 = arith.constant 8 : i32
    %4 = arith.muli %arg0, %c8_i32 : i32
    %5 = vector.broadcast %4 : i32 to vector<8x1xi32>
    %6 = arith.addi %5, %3 : vector<8x1xi32>
    %c8_i32_3 = arith.constant 8 : i32
    %7 = vector.broadcast %c8_i32_3 : i32 to vector<8x1xi32>
    %8 = arith.cmpi slt, %6, %7 : vector<8x1xi32>
    %9 = vector.broadcast %1 : vector<8x1xi32> to vector<8x4xi32>
    %10 = arith.cmpi eq, %2, %9 : vector<8x4xi32>
    %cst = arith.constant dense<0xFF800000> : vector<8xf32>
    %11 = vector.multi_reduction <maximumf>, %0, %cst [1] : vector<8x4xf32> to vector<8xf32>
    %12 = vector.shape_cast %11 : vector<8xf32> to vector<8x1xf32>
    %13 = vector.broadcast %12 : vector<8x1xf32> to vector<8x4xf32>
    %14 = arith.subf %0, %13 : vector<8x4xf32>
    %15 = math.exp %14 : vector<8x4xf32>
    %cst_4 = arith.constant dense<0.000000e+00> : vector<8xf32>
    %16 = vector.multi_reduction <add>, %15, %cst_4 [1] : vector<8x4xf32> to vector<8xf32>
    %17 = vector.shape_cast %16 : vector<8xf32> to vector<8x1xf32>
    %18 = math.log %17 : vector<8x1xf32>
    %19 = arith.addf %18, %12 : vector<8x1xf32>
    %cst_5 = arith.constant 0.000000e+00 : f32
    %20 = vector.broadcast %cst_5 : f32 to vector<8x4xf32>
    %21 = arith.select %10, %0, %20 : vector<8x4xi1>, vector<8x4xf32>
    %cst_6 = arith.constant dense<0.000000e+00> : vector<8xf32>
    %22 = vector.multi_reduction <add>, %21, %cst_6 [1] : vector<8x4xf32> to vector<8xf32>
    %23 = vector.shape_cast %22 : vector<8xf32> to vector<8x1xf32>
    %24 = arith.subf %19, %23 : vector<8x1xf32>
    %cst_7 = arith.constant 0.000000e+00 : f32
    %25 = vector.broadcast %cst_7 : f32 to vector<8x1xf32>
    %26 = arith.maximumf %24, %25 : vector<8x1xf32>
    %cst_8 = arith.constant 0.000000e+00 : f32
    %27 = vector.broadcast %cst_8 : f32 to vector<8x1xf32>
    %28 = arith.subf %27, %26 : vector<8x1xf32>
    %29 = math.exp %28 : vector<8x1xf32>
    %cst_9 = arith.constant 1.000000e+00 : f32
    %30 = vector.broadcast %cst_9 : f32 to vector<8x1xf32>
    %31 = arith.subf %30, %29 : vector<8x1xf32>
    %32 = arith.mulf %31, %31 : vector<8x1xf32>
    %33 = arith.mulf %32, %26 : vector<8x1xf32>
    %cst_10 = arith.constant 0.000000e+00 : f32
    %34 = vector.broadcast %cst_10 : f32 to vector<8x1xf32>
    %35 = arith.select %8, %33, %34 : vector<8x1xi1>, vector<8x1xf32>
    %cst_11 = arith.constant dense<0.000000e+00> : vector<1xf32>
    %36 = vector.multi_reduction <add>, %35, %cst_11 [0] : vector<8x1xf32> to vector<1xf32>
    %37 = vector.shape_cast %36 : vector<1xf32> to vector<1x1xf32>
    %c0_12 = arith.constant 0 : index
    %c0_13 = arith.constant 0 : index
    %38 = vector.load %arg3[%c0_12, %c0_13] : memref<1x1xf32, #tpu.memory_space<vmem>>, vector<1x1xf32>
    tpu.vector_store %arg3[%c0_12, %c0_13], %37 {strides = array<i32>} : memref<1x1xf32, #tpu.memory_space<vmem>>, vector<1x1xf32>,
    return
  }
  func.func @transform_0(%arg0: i32) -> (i32, i32) {
    %c0_i32 = arith.constant 0 : i32
    %c0_i32_0 = arith.constant 0 : i32
    return %arg0, %c0_i32 : i32, i32
  }
  func.func @transform_1(%arg0: i32) -> (i32, i32) {
    %c0_i32 = arith.constant 0 : i32
    %c0_i32_0 = arith.constant 0 : i32
    return %arg0, %c0_i32 : i32, i32
  }
  func.func @transform_2(%arg0: i32) -> (i32, i32) {
    %c0_i32 = arith.constant 0 : i32
    %c0_i32_0 = arith.constant 0 : i32
    return %arg0, %c0_i32 : i32, i32
  }
}

</mosaic_0001>

<bundles_post_ra>
// kernel: tpu_custom_call.1
= control target key start
LH: loop header
LB: loop body
LE: loop exit
PB: predicated region body
PF: predicated region fallthrough
CT: control target
= control target key end

     0   :  { %vm26_vm0 = vcmask 31744   ;;  %s145_s0 = inlined_call_operand.vmem [shape: f32[8,4], index: 0, kind: input, shape index: {}]   ;;  %s146_s1 = inlined_call_operand.vmem [shape: s32[8,1], index: 1, kind: input, shape index: {}]   ;;  %s147_s2 = inlined_call_operand.hbm [shape: f32[1,1], index: 2, kind: output, shape index: {}]  }
   0x1   :  { %v12_v0 = vld [vmem:[%s145_s0] sm:$0xff] }
   0x2   :  { %7 = vsyncpa [#allocation3], 0  ;;  %v27_v1 = vsel %vm26_vm0, %v12_v0, -inf  ;;  %v107_v2 = vmov 0   ;;  %v13_v3 = vld [vmem:[%s146_s1] sm:$0xff]  ;;  %v14_v7 = vlaneseq  ;;  %s108_s0 = smov [#allocation2]  }
   0x3   :  { %76 = vset.pattern.permute.xlu0 %v107_v2  ;;  %s66_s1 = sshll.u32 %s108_s0, 4  ;;  %vm58_vm2 = vcmask 0   ;;  %s67_s1 = int_to_ptr.vmem [resolvable:$true] %s66_s1 }
   0x4   :  { %28 = vmax.xlane.f32.xlu0 %v27_v1  ;;  %v15_v8 = vand.u32 127, %v14_v7  ;;  %s83_s13 = scalar_lea.vmem %s67_s1, 16  ;;  %s87_s14 = scalar_lea.vmem %s67_s1, 32 }
   0x5   :  { %p84_p0 = scmp.ne.s32.totalorder %s67_s1, %s83_s13  ;;  %p88_p1 = scmp.lt.s32.totalorder %s67_s1, %s67_s1 }
   0x6   :  { %p89_p2 = scmp.lt.s32.totalorder %s87_s14, %s83_s13 }
   0x8   :  { %p90_p3 = por %p89_p2, %p88_p1 }
   0xa   :  { %p91_p4 = pnand %p90_p3, %p84_p0 }
  0x1a   :  { %23 = vperm.xlu0 %76, %v13_v3  }
  0x91   :  { %v29_v4 = vpop.xlane.xlu0 %28 }
  0x92   :  { %v30_v5 = vsub.f32 %v12_v0, %v29_v4 }
  0x94   :  { %v31_v6 = vmul.f32 1.442695, %v30_v5 }
  0x96   :  { %77 = vpow2.f32 %v31_v6 }
  0x99   :  { %v24_v9 = vpop.permute.xlu0 %23 }
  0x9a   :  { %vm25_vm1 = vcmp.eq.s32.totalorder %v15_v8, %v24_v9 }
  0x9b   :  { %v39_v11 = vsel %vm25_vm1, %v12_v0, 0.0 }
  0x9c   :  { %v40_v13 = vsel %vm26_vm0, %v39_v11, 0.0 }
  0xa0   :  { %v78_v10 = vpop.eup %77 }
  0xa1   :  { %v33_v12 = vsel %vm26_vm0, %v78_v10, 0.0 }
  0xa2   :  { %34 = vadd.xlane.f32.xlu1 %v33_v12 }
  0xa6   :  { %41 = vadd.xlane.f32.xlu1 %v40_v13 }
 0x12f   :  { %v35_v14 = vpop.xlane.xlu1 %34 }
 0x130   :  { %79 = vlog2.f32 %v35_v14 }
 0x133   :  { %v42_v17 = vpop.xlane.xlu1 %41 }
 0x13a   :  { %v80_v15 = vpop.eup %79 }
 0x13b   :  { %v37_v16 = vmul.f32 0.6931472, %v80_v15 }
 0x13d   :  { %v38_v18 = vadd.f32 %v37_v16, %v29_v4 }
 0x13f   :  { %v43_v19 = vsub.f32 %v38_v18, %v42_v17 }
 0x141   :  { %v44_v20 = vmax.f32 %v43_v19, 0.0 }
 0x143   :  { %v45_v21 = vsub.f32 0.0, %v44_v20 }
 0x145   :  { %v46_v22 = vmul.f32 1.442695, %v45_v21 }
 0x147   :  { %81 = vpow2.f32 %v46_v22 }
 0x151   :  { %v82_v23 = vpop.eup %81 }
 0x152   :  { %v48_v24 = vsub.f32 1.0, %v82_v23 }
 0x154   :  { %v49_v25 = vmul.f32 %v48_v24, %v48_v24 }
 0x156   :  { %v50_v26 = vmul.f32 %v49_v25, %v44_v20 }
 0x158   :  { %v52_v27 = vrot.slane %v50_v26, 4 }
 0x15a   :  { %v53_v28 = vadd.f32 %v52_v27, %v50_v26 }
 0x15c   :  { %v54_v29 = vrot.slane %v53_v28, 2 }
 0x15e   :  { %v55_v30 = vadd.f32 %v54_v29, %v53_v28 }
 0x160   :  { %v56_v31 = vrot.slane %v55_v30, 1 }
 0x162   :  { %v57_v32 = vadd.f32 %v56_v31, %v55_v30 }
 0x164   :  { %59 = vst.msk [vmem:[#allocation2] sm:$0x1] %vm58_vm2, %v57_v32 }
 0x165   :  { %94 = shalt.err (!%p91_p4)
}
 0x166   :  { %s95_s17 = scalar_lea.hbm %s147_s2, 16 }
 0x167   :  { %p96_p5 = scmp.ne.s32.totalorder %s147_s2, %s95_s17  ;;  %p99_p6 = scmp.lt.u32.totalorder %s95_s17, %s147_s2 }
 0x169   :  { %p101_p7 = pnand %p99_p6, %p96_p5 }
 0x16b   :  { %104 = shalt.err (!%p101_p7)
}
 0x16c   :  { %69 = dma.vmem_to_hbm [thread:$0]  %s67_s1, 16, %s147_s2, [#allocation3]  }
 0x16d   :  { %105 = dma.done.wait [#allocation3], 16  }
 0x16e   :  { %106 = vsyncadd [#allocation3], 4294967280 }
 0x16f   :  { %73 = vsyncpa [#allocation3], 1 }

</bundles_post_ra>
